<compile_context>
chip_gen: v7x
topology: tpu7x:2x2x1
jax: 0.10.0
libtpu: 0.0.40
codegen_flags: <defaults>
</compile_context>

<pallas_src>
import jax
import jax.numpy as jnp
from jax import lax
from jax.experimental import pallas as pl
from jax.experimental.pallas import tpu as pltpu


def _make_viewmorph_kernel(img_dim: int, tile_out: int):
    D = img_dim

    def kernel(pk_ref, im1_ref, im2_ref, out_ref, ra_ref, rb_ref, oob_ref):
        t = pl.program_id(2)          # inner ("arbitrary") output-pixel axis

        pk = pk_ref[0]                # (6, T): rows = q+C (2), q-C (2), M1, M2
        im1 = im1_ref[0]              # (3*D, D)  row index = channel*D + row
        im2 = im2_ref[0]              # (3*D, D)

        qa = pk[0:2]                  # (2, T) sampling coords for image 1
        qb = pk[2:4]                  # (2, T) sampling coords for image 2
        m1 = pk[4:5]                  # (1, T)
        m2 = pk[5:6]                  # (1, T)

        # Input-pixel index along one spatial axis (shared by both samples).
        iota_d = lax.broadcasted_iota(jnp.int32, (D, tile_out), 0)

        def axis_weights(coord):
            # coord: (1, T) clamped coordinate along one spatial axis.
            # Reproduces torch's floor/ceil neighbor weights exactly (an
            # exactly-integer coordinate is counted twice with weight 1 each).
            nf = jnp.floor(coord)
            nc = jnp.ceil(coord)
            wf = 1.0 - (coord - nf)          # 1 - |x - floor(x)|
            wc = 1.0 - (nc - coord)          # 1 - |x - ceil(x)|
            return (jnp.where(iota_d == nf.astype(jnp.int32), wf, 0.0) +
                    jnp.where(iota_d == nc.astype(jnp.int32), wc, 0.0))  # (D,T)

        def sample(qi_orig, imrd):
            # torch.clamp(qi, 0.001, dim - 1.001)
            qi = jnp.clip(qi_orig, 0.001, D - 1.001)          # (2, T)
            wrow = axis_weights(qi[0:1])                      # (D, T) rows
            wcol = axis_weights(qi[1:2])                      # (D, T) cols
            # Column contraction on the MXU; precision pinned to full-f32
            # passes (Precision.HIGH / bf16x3 is not supported by the Mosaic
            # dot lowering).
            tmp = jnp.dot(imrd, wcol,
                          preferred_element_type=jnp.float32,
                          precision=lax.Precision.HIGHEST)    # (3*D, T)
            # Fused per-channel row contraction: one reshape + mul + reduce
            # (no per-channel slices / concatenate).  Copy-free: D % 8 == 0.
            res = jnp.sum(tmp.reshape(3, D, tile_out) * wrow[None, :, :],
                          axis=1)                             # (3, T)
            # Lane-parallel squared out-of-bounds displacement.
            oob = jnp.sum((qi_orig - qi) ** 2, axis=0, keepdims=True)  # (1, T)
            return res, oob

        res_a, oob_a = sample(qa, im1)
        res_b, oob_b = sample(qb, im2)

        out_ref[0] = res_a * m1 + res_b * m2    # masked sum a + b
        ra_ref[0] = res_a                       # unmasked resampled image 1
        rb_ref[0] = res_b                       # unmasked resampled image 2

        # Per-(batch, outer-tile) lane-parallel OOB accumulator, resident
        # across the inner (arbitrary) axis; cross-lane sum in the wrapper.
        @pl.when(t == 0)
        def _():
            oob_ref[...] = jnp.zeros_like(oob_ref)
        oob_ref[0] += oob_a + oob_b

    return kernel


def _device_defaults():
    """Generation-aware (output-tile cap, scoped VMEM limit)."""
    try:
        kind = jax.devices()[0].device_kind.lower()
    except Exception:
        kind = ""
    if "v6" in kind or "trillium" in kind:
        return 8192, 96 << 20        # 128 MiB physical VMEM, big tiles pay off
    if "v5" in kind:
        return 2048, 96 << 20        # raise the 16 MiB scoped default
    if "v7" in kind:
        return 4096, 48 << 20        # 64 MiB physical VMEM -> smaller budget
    return 2048, 48 << 20            # conservative fallback


def _pick_tile_out(HW, cap):
    if HW <= cap:
        return HW
    t = (cap // 128) * 128
    while t >= 128:
        if HW % t == 0:
            return t                 # lane-dense divisor of HW
        t -= 128
    return HW                        # no lane-dense divisor; single tile


def view_morphing(im1, im2, C, M1, M2, img_dim: int,
                  tile_out=None, outer_tiles=None, vmem_limit_bytes=None):
    """Pallas implementation of ViewMorphing.forward([im1, im2, C, M1, M2])."""
    N = im1.shape[0]
    D = img_dim
    HW = D * D
    assert D % 8 == 0, "img_dim must be a multiple of 8 (copy-free reshapes)"

    tile_cap, vmem_default = _device_defaults()
    if tile_out is None:
        tile_out = _pick_tile_out(HW, tile_cap)
    if vmem_limit_bytes is None:
        vmem_limit_bytes = vmem_default
    assert HW % tile_out == 0, "tile_out must divide img_dim**2"
    assert tile_out == HW or tile_out % 128 == 0, "tile_out must be lane-dense"
    n_tiles = HW // tile_out

    # With a single image the batch axis gives no core-level parallelism
    # (v7x has 2 TensorCores): split the pixel axis into a parallel outer
    # part and an arbitrary inner part instead.
    if outer_tiles is None:
        outer_tiles = 2 if (N == 1 and n_tiles % 2 == 0) else 1
    assert n_tiles % outer_tiles == 0
    n_inner = n_tiles // outer_tiles

    # q[0, k] = k // D (row), q[1, k] = k % D (col)  -- matches coordToInd.
    xs = jnp.arange(D, dtype=jnp.float32)
    q = jnp.stack([jnp.repeat(xs, D), jnp.tile(xs, D)], axis=0)      # (2, HW)

    # Pack all small per-pixel inputs into a single (N, 6, HW) tensor:
    # rows 0:2 = q + C, rows 2:4 = q - C, row 4 = M1, row 5 = M2.
    Cf = C.reshape(N, 2, HW).astype(jnp.float32)
    packed = jnp.concatenate(
        [q[None] + Cf, q[None] - Cf,
         M1.reshape(N, 1, HW).astype(jnp.float32),
         M2.reshape(N, 1, HW).astype(jnp.float32)], axis=1)          # (N, 6, HW)

    # Images as (N, 3*D, D): row index = channel*D + image_row, so the kernel
    # contracts image columns with a (D, T) weight on the MXU with no reshape.
    im1r = im1.reshape(N, 3 * D, D).astype(jnp.float32)
    im2r = im2.reshape(N, 3 * D, D).astype(jnp.float32)

    kernel = _make_viewmorph_kernel(D, tile_out)

    out_shape = (
        jax.ShapeDtypeStruct((N, 3, HW), jnp.float32),               # a + b
        jax.ShapeDtypeStruct((N, 3, HW), jnp.float32),               # res_imga
        jax.ShapeDtypeStruct((N, 3, HW), jnp.float32),               # res_imgb
        jax.ShapeDtypeStruct((N * outer_tiles, 1, tile_out), jnp.float32),
    )
    pix_map = lambda n, o, t: (n, 0, o * n_inner + t)
    grid_spec = pltpu.PrefetchScalarGridSpec(
        num_scalar_prefetch=0,
        grid=(N, outer_tiles, n_inner),
        in_specs=[
            pl.BlockSpec((1, 6, tile_out), pix_map),                  # packed
            pl.BlockSpec((1, 3 * D, D), lambda n, o, t: (n, 0, 0)),   # im1
            pl.BlockSpec((1, 3 * D, D), lambda n, o, t: (n, 0, 0)),   # im2
        ],
        out_specs=[
            pl.BlockSpec((1, 3, tile_out), pix_map),
            pl.BlockSpec((1, 3, tile_out), pix_map),
            pl.BlockSpec((1, 3, tile_out), pix_map),
            pl.BlockSpec((1, 1, tile_out),
                         lambda n, o, t: (n * outer_tiles + o, 0, 0)),
        ],
    )
    out_sum_f, ra_f, rb_f, oob_f = pl.pallas_call(
        kernel,
        out_shape=out_shape,
        grid_spec=grid_spec,
        compiler_params=pltpu.CompilerParams(
            dimension_semantics=("parallel", "parallel", "arbitrary"),
            vmem_limit_bytes=vmem_limit_bytes),
    )(packed, im1r, im2r)

    # oob_loss_a + oob_loss_b = (sum_a + sum_b) / (N*2*HW) / D^2 * 0.01
    oob_loss = jnp.sum(oob_f) / (N * 2 * HW) / (D ** 2) * 0.01

    out_sum = out_sum_f.reshape(N, 3, D, D)
    res_a = ra_f.reshape(N, 3, D, D)
    res_b = rb_f.reshape(N, 3, D, D)

    # TODO(synk): the PyTorch forward also computes C_x/C_y first/second
    # differences but never uses or returns them (dead code) -> omitted.
    return out_sum, oob_loss, C, M1, M2, res_a, res_b


# ---------------------------------------------------------------------------
# Pure-JAX reference (mirrors the PyTorch math) for a correctness check.
# ---------------------------------------------------------------------------
def _reference(im1, im2, C, M1, M2, img_dim):
    N = im1.shape[0]
    HW = img_dim * img_dim
    xs = jnp.arange(img_dim, dtype=jnp.float32)
    q = jnp.stack([jnp.repeat(xs, img_dim), jnp.tile(xs, img_dim)], axis=0)
    Cf = C.reshape(N, 2, HW)

    def masked_rp(image, mask, qi_orig):
        imflat = image.reshape(N, 3, HW)
        qi = jnp.clip(qi_orig, 0.001, img_dim - 1.001)

        def get_pixel(neighbor):
            w = 1.0 - jnp.abs(qi - neighbor)
            w = w[:, 0] * w[:, 1]                                   # (N, HW)
            inds = (neighbor[:, 1] + img_dim * neighbor[:, 0]).astype(jnp.int32)
            inds3 = jnp.broadcast_to(inds[:, None, :], (N, 3, HW))
            pix = jnp.take_along_axis(imflat, inds3, axis=2)        # (N, 3, HW)
            return w[:, None, :] * pix

        xf = jnp.floor(qi[:, 0:1]); xc = jnp.ceil(qi[:, 0:1])
        yf = jnp.floor(qi[:, 1:2]); yc = jnp.ceil(qi[:, 1:2])
        res = (get_pixel(jnp.concatenate([xf, yf], 1)) +
               get_pixel(jnp.concatenate([xc, yf], 1)) +
               get_pixel(jnp.concatenate([xf, yc], 1)) +
               get_pixel(jnp.concatenate([xc, yc], 1)))
        oob = jnp.mean((qi_orig - qi) ** 2) / (img_dim ** 2) * 0.01
        res_img = res.reshape(N, 3, img_dim, img_dim)
        return res_img, res_img * mask, oob

    ra, a, la = masked_rp(im1, M1, q[None] + Cf)
    rb, b, lb = masked_rp(im2, M2, q[None] - Cf)
    return a + b, la + lb, ra, rb


if __name__ == "__main__":
    def run_case(N, img_dim, tile_out):
        key = jax.random.PRNGKey(0)
        k1, k2, k3, k4, k5 = jax.random.split(key, 5)
        im1 = jax.random.uniform(k1, (N, 3, img_dim, img_dim), jnp.float32)
        im2 = jax.random.uniform(k2, (N, 3, img_dim, img_dim), jnp.float32)
        # correspondence field (pixel displacements), includes out-of-bounds
        C = jax.random.uniform(k3, (N, 2, img_dim, img_dim), jnp.float32,
                               minval=-3.0, maxval=3.0)
        M1 = jax.random.uniform(k4, (N, 1, img_dim, img_dim), jnp.float32)
        M2 = jax.random.uniform(k5, (N, 1, img_dim, img_dim), jnp.float32)

        out = view_morphing(im1, im2, C, M1, M2, img_dim, tile_out=tile_out)
        out = jax.block_until_ready(out)
        out_sum, oob_loss, _, _, _, res_a, res_b = out

        ref_sum, ref_loss, ref_ra, ref_rb = _reference(im1, im2, C, M1, M2,
                                                       img_dim)
        assert jnp.allclose(out_sum, ref_sum, atol=1e-4, rtol=1e-4)
        assert jnp.allclose(res_a, ref_ra, atol=1e-4, rtol=1e-4)
        assert jnp.allclose(res_b, ref_rb, atol=1e-4, rtol=1e-4)
        assert jnp.allclose(oob_loss, ref_loss, atol=1e-6, rtol=1e-4)

    # Batch-parallel axis + multi-tile inner axis with OOB accumulation.
    run_case(N=2, img_dim=16, tile_out=128)
    # Single-image case: exercises the parallel outer pixel split (v7x path)
    # with per-(batch, outer) OOB partials and inner accumulation.
    run_case(N=1, img_dim=32, tile_out=128)

    print("KERNEL_OK")
</pallas_src>

<mosaic_0001>
module attributes {stable_mosaic.version = 11 : i64} {
  func.func @kernel(%arg0: i32, %arg1: i32, %arg2: i32, %arg3: memref<1x6x128xf32, #tpu.memory_space<vmem>>, %arg4: memref<1x48x16xf32, #tpu.memory_space<vmem>>, %arg5: memref<1x48x16xf32, #tpu.memory_space<vmem>>, %arg6: memref<1x3x128xf32, #tpu.memory_space<vmem>>, %arg7: memref<1x3x128xf32, #tpu.memory_space<vmem>>, %arg8: memref<1x3x128xf32, #tpu.memory_space<vmem>>, %arg9: memref<1x1x128xf32, #tpu.memory_space<vmem>>) attributes {dimension_semantics = [#tpu.dimension_semantics<parallel>, #tpu.dimension_semantics<parallel>, #tpu.dimension_semantics<arbitrary>], iteration_bounds = array<i64: 2, 1, 2>, scalar_prefetch = 0 : i64, scratch_operands = 0 : i64, tpu.core_type = #tpu.core_type<tc>, window_params = [{transform_indices = @transform_0, window_bounds = array<i64: 1, 6, 128>}, {transform_indices = @transform_1, window_bounds = array<i64: 1, 48, 16>}, {transform_indices = @transform_2, window_bounds = array<i64: 1, 48, 16>}, {transform_indices = @transform_3, window_bounds = array<i64: 1, 3, 128>}, {transform_indices = @transform_4, window_bounds = array<i64: 1, 3, 128>}, {transform_indices = @transform_5, window_bounds = array<i64: 1, 3, 128>}, {transform_indices = @transform_6, window_bounds = array<i64: 1, 1, 128>}]} {
    %c0 = arith.constant 0 : index
    %c0_0 = arith.constant 0 : index
    %c0_1 = arith.constant 0 : index
    %0 = vector.load %arg3[%c0, %c0_0, %c0_1] : memref<1x6x128xf32, #tpu.memory_space<vmem>>, vector<1x6x128xf32>
    %1 = vector.shape_cast %0 : vector<1x6x128xf32> to vector<6x128xf32>
    %c0_2 = arith.constant 0 : index
    %c0_3 = arith.constant 0 : index
    %c0_4 = arith.constant 0 : index
    %2 = vector.load %arg4[%c0_2, %c0_3, %c0_4] : memref<1x48x16xf32, #tpu.memory_space<vmem>>, vector<1x48x16xf32>
    %3 = vector.shape_cast %2 : vector<1x48x16xf32> to vector<48x16xf32>
    %c0_5 = arith.constant 0 : index
    %c0_6 = arith.constant 0 : index
    %c0_7 = arith.constant 0 : index
    %4 = vector.load %arg5[%c0_5, %c0_6, %c0_7] : memref<1x48x16xf32, #tpu.memory_space<vmem>>, vector<1x48x16xf32>
    %5 = vector.shape_cast %4 : vector<1x48x16xf32> to vector<48x16xf32>
    %6 = vector.extract_strided_slice %1 {offsets = [0, 0], sizes = [2, 128], strides = [1, 1]} : vector<6x128xf32> to vector<2x128xf32>
    %7 = vector.extract_strided_slice %1 {offsets = [2, 0], sizes = [2, 128], strides = [1, 1]} : vector<6x128xf32> to vector<2x128xf32>
    %8 = vector.extract_strided_slice %1 {offsets = [4, 0], sizes = [1, 128], strides = [1, 1]} : vector<6x128xf32> to vector<1x128xf32>
    %9 = vector.extract_strided_slice %1 {offsets = [5, 0], sizes = [1, 128], strides = [1, 1]} : vector<6x128xf32> to vector<1x128xf32>
    %10 = tpu.iota {dimensions = array<i32: 0>} : vector<16x128xi32>
    %cst = arith.constant 1.000000e-03 : f32
    %cst_8 = arith.constant 1.499900e+01 : f32
    %11 = vector.broadcast %cst : f32 to vector<2x128xf32>
    %12 = arith.maximumf %11, %6 : vector<2x128xf32>
    %13 = vector.broadcast %cst_8 : f32 to vector<2x128xf32>
    %14 = arith.minimumf %13, %12 : vector<2x128xf32>
    %15 = vector.extract_strided_slice %14 {offsets = [0, 0], sizes = [1, 128], strides = [1, 1]} : vector<2x128xf32> to vector<1x128xf32>
    %16 = math.floor %15 : vector<1x128xf32>
    %17 = math.ceil %15 : vector<1x128xf32>
    %18 = arith.subf %15, %16 : vector<1x128xf32>
    %cst_9 = arith.constant 1.000000e+00 : f32
    %19 = vector.broadcast %cst_9 : f32 to vector<1x128xf32>
    %20 = arith.subf %19, %18 : vector<1x128xf32>
    %21 = arith.subf %17, %15 : vector<1x128xf32>
    %cst_10 = arith.constant 1.000000e+00 : f32
    %22 = vector.broadcast %cst_10 : f32 to vector<1x128xf32>
    %23 = arith.subf %22, %21 : vector<1x128xf32>
    %24 = arith.fptosi %16 : vector<1x128xf32> to vector<1x128xi32>
    %25 = vector.broadcast %24 : vector<1x128xi32> to vector<16x128xi32>
    %26 = arith.cmpi eq, %10, %25 : vector<16x128xi32>
    %cst_11 = arith.constant 0.000000e+00 : f32
    %27 = vector.shape_cast %20 : vector<1x128xf32> to vector<1x128xf32>
    %28 = vector.broadcast %27 : vector<1x128xf32> to vector<16x128xf32>
    %29 = vector.broadcast %cst_11 : f32 to vector<16x128xf32>
    %30 = arith.select %26, %28, %29 : vector<16x128xi1>, vector<16x128xf32>
    %31 = arith.fptosi %17 : vector<1x128xf32> to vector<1x128xi32>
    %32 = vector.broadcast %31 : vector<1x128xi32> to vector<16x128xi32>
    %33 = arith.cmpi eq, %10, %32 : vector<16x128xi32>
    %cst_12 = arith.constant 0.000000e+00 : f32
    %34 = vector.shape_cast %23 : vector<1x128xf32> to vector<1x128xf32>
    %35 = vector.broadcast %34 : vector<1x128xf32> to vector<16x128xf32>
    %36 = vector.broadcast %cst_12 : f32 to vector<16x128xf32>
    %37 = arith.select %33, %35, %36 : vector<16x128xi1>, vector<16x128xf32>
    %38 = arith.addf %30, %37 : vector<16x128xf32>
    %39 = vector.extract_strided_slice %14 {offsets = [1, 0], sizes = [1, 128], strides = [1, 1]} : vector<2x128xf32> to vector<1x128xf32>
    %40 = math.floor %39 : vector<1x128xf32>
    %41 = math.ceil %39 : vector<1x128xf32>
    %42 = arith.subf %39, %40 : vector<1x128xf32>
    %cst_13 = arith.constant 1.000000e+00 : f32
    %43 = vector.broadcast %cst_13 : f32 to vector<1x128xf32>
    %44 = arith.subf %43, %42 : vector<1x128xf32>
    %45 = arith.subf %41, %39 : vector<1x128xf32>
    %cst_14 = arith.constant 1.000000e+00 : f32
    %46 = vector.broadcast %cst_14 : f32 to vector<1x128xf32>
    %47 = arith.subf %46, %45 : vector<1x128xf32>
    %48 = arith.fptosi %40 : vector<1x128xf32> to vector<1x128xi32>
    %49 = vector.broadcast %48 : vector<1x128xi32> to vector<16x128xi32>
    %50 = arith.cmpi eq, %10, %49 : vector<16x128xi32>
    %cst_15 = arith.constant 0.000000e+00 : f32
    %51 = vector.shape_cast %44 : vector<1x128xf32> to vector<1x128xf32>
    %52 = vector.broadcast %51 : vector<1x128xf32> to vector<16x128xf32>
    %53 = vector.broadcast %cst_15 : f32 to vector<16x128xf32>
    %54 = arith.select %50, %52, %53 : vector<16x128xi1>, vector<16x128xf32>
    %55 = arith.fptosi %41 : vector<1x128xf32> to vector<1x128xi32>
    %56 = vector.broadcast %55 : vector<1x128xi32> to vector<16x128xi32>
    %57 = arith.cmpi eq, %10, %56 : vector<16x128xi32>
    %cst_16 = arith.constant 0.000000e+00 : f32
    %58 = vector.shape_cast %47 : vector<1x128xf32> to vector<1x128xf32>
    %59 = vector.broadcast %58 : vector<1x128xf32> to vector<16x128xf32>
    %60 = vector.broadcast %cst_16 : f32 to vector<16x128xf32>
    %61 = arith.select %57, %59, %60 : vector<16x128xi1>, vector<16x128xf32>
    %62 = arith.addf %54, %61 : vector<16x128xf32>
    %cst_17 = arith.constant dense<0.000000e+00> : vector<48x128xf32>
    %63 = tpu.matmul %3, %62, %cst_17 {dimension_numbers = #tpu.dot_dimension_numbers<[1], [0], [0], [1], [0, 0, 1, 1], [], []>, precision = #tpu.contract_precision<fp32>} : vector<48x16xf32>, vector<16x128xf32>, vector<48x128xf32> -> vector<48x128xf32>
    %64 = vector.shape_cast %63 : vector<48x128xf32> to vector<3x16x128xf32>
    %65 = vector.shape_cast %38 : vector<16x128xf32> to vector<1x16x128xf32>
    %66 = vector.broadcast %65 : vector<1x16x128xf32> to vector<3x16x128xf32>
    %67 = arith.mulf %64, %66 : vector<3x16x128xf32>
    %cst_18 = arith.constant dense<0.000000e+00> : vector<3x128xf32>
    %68 = vector.multi_reduction <add>, %67, %cst_18 [1] : vector<3x16x128xf32> to vector<3x128xf32>
    %69 = arith.subf %6, %14 : vector<2x128xf32>
    %70 = arith.mulf %69, %69 : vector<2x128xf32>
    %cst_19 = arith.constant dense<0.000000e+00> : vector<128xf32>
    %71 = vector.multi_reduction <add>, %70, %cst_19 [0] : vector<2x128xf32> to vector<128xf32>
    %72 = vector.shape_cast %71 : vector<128xf32> to vector<1x128xf32>
    %cst_20 = arith.constant 1.000000e-03 : f32
    %cst_21 = arith.constant 1.499900e+01 : f32
    %73 = vector.broadcast %cst_20 : f32 to vector<2x128xf32>
    %74 = arith.maximumf %73, %7 : vector<2x128xf32>
    %75 = vector.broadcast %cst_21 : f32 to vector<2x128xf32>
    %76 = arith.minimumf %75, %74 : vector<2x128xf32>
    %77 = vector.extract_strided_slice %76 {offsets = [0, 0], sizes = [1, 128], strides = [1, 1]} : vector<2x128xf32> to vector<1x128xf32>
    %78 = math.floor %77 : vector<1x128xf32>
    %79 = math.ceil %77 : vector<1x128xf32>
    %80 = arith.subf %77, %78 : vector<1x128xf32>
    %cst_22 = arith.constant 1.000000e+00 : f32
    %81 = vector.broadcast %cst_22 : f32 to vector<1x128xf32>
    %82 = arith.subf %81, %80 : vector<1x128xf32>
    %83 = arith.subf %79, %77 : vector<1x128xf32>
    %cst_23 = arith.constant 1.000000e+00 : f32
    %84 = vector.broadcast %cst_23 : f32 to vector<1x128xf32>
    %85 = arith.subf %84, %83 : vector<1x128xf32>
    %86 = arith.fptosi %78 : vector<1x128xf32> to vector<1x128xi32>
    %87 = vector.broadcast %86 : vector<1x128xi32> to vector<16x128xi32>
    %88 = arith.cmpi eq, %10, %87 : vector<16x128xi32>
    %cst_24 = arith.constant 0.000000e+00 : f32
    %89 = vector.shape_cast %82 : vector<1x128xf32> to vector<1x128xf32>
    %90 = vector.broadcast %89 : vector<1x128xf32> to vector<16x128xf32>
    %91 = vector.broadcast %cst_24 : f32 to vector<16x128xf32>
    %92 = arith.select %88, %90, %91 : vector<16x128xi1>, vector<16x128xf32>
    %93 = arith.fptosi %79 : vector<1x128xf32> to vector<1x128xi32>
    %94 = vector.broadcast %93 : vector<1x128xi32> to vector<16x128xi32>
    %95 = arith.cmpi eq, %10, %94 : vector<16x128xi32>
    %cst_25 = arith.constant 0.000000e+00 : f32
    %96 = vector.shape_cast %85 : vector<1x128xf32> to vector<1x128xf32>
    %97 = vector.broadcast %96 : vector<1x128xf32> to vector<16x128xf32>
    %98 = vector.broadcast %cst_25 : f32 to vector<16x128xf32>
    %99 = arith.select %95, %97, %98 : vector<16x128xi1>, vector<16x128xf32>
    %100 = arith.addf %92, %99 : vector<16x128xf32>
    %101 = vector.extract_strided_slice %76 {offsets = [1, 0], sizes = [1, 128], strides = [1, 1]} : vector<2x128xf32> to vector<1x128xf32>
    %102 = math.floor %101 : vector<1x128xf32>
    %103 = math.ceil %101 : vector<1x128xf32>
    %104 = arith.subf %101, %102 : vector<1x128xf32>
    %cst_26 = arith.constant 1.000000e+00 : f32
    %105 = vector.broadcast %cst_26 : f32 to vector<1x128xf32>
    %106 = arith.subf %105, %104 : vector<1x128xf32>
    %107 = arith.subf %103, %101 : vector<1x128xf32>
    %cst_27 = arith.constant 1.000000e+00 : f32
    %108 = vector.broadcast %cst_27 : f32 to vector<1x128xf32>
    %109 = arith.subf %108, %107 : vector<1x128xf32>
    %110 = arith.fptosi %102 : vector<1x128xf32> to vector<1x128xi32>
    %111 = vector.broadcast %110 : vector<1x128xi32> to vector<16x128xi32>
    %112 = arith.cmpi eq, %10, %111 : vector<16x128xi32>
    %cst_28 = arith.constant 0.000000e+00 : f32
    %113 = vector.shape_cast %106 : vector<1x128xf32> to vector<1x128xf32>
    %114 = vector.broadcast %113 : vector<1x128xf32> to vector<16x128xf32>
    %115 = vector.broadcast %cst_28 : f32 to vector<16x128xf32>
    %116 = arith.select %112, %114, %115 : vector<16x128xi1>, vector<16x128xf32>
    %117 = arith.fptosi %103 : vector<1x128xf32> to vector<1x128xi32>
    %118 = vector.broadcast %117 : vector<1x128xi32> to vector<16x128xi32>
    %119 = arith.cmpi eq, %10, %118 : vector<16x128xi32>
    %cst_29 = arith.constant 0.000000e+00 : f32
    %120 = vector.shape_cast %109 : vector<1x128xf32> to vector<1x128xf32>
    %121 = vector.broadcast %120 : vector<1x128xf32> to vector<16x128xf32>
    %122 = vector.broadcast %cst_29 : f32 to vector<16x128xf32>
    %123 = arith.select %119, %121, %122 : vector<16x128xi1>, vector<16x128xf32>
    %124 = arith.addf %116, %123 : vector<16x128xf32>
    %cst_30 = arith.constant dense<0.000000e+00> : vector<48x128xf32>
    %125 = tpu.matmul %5, %124, %cst_30 {dimension_numbers = #tpu.dot_dimension_numbers<[1], [0], [0], [1], [0, 0, 1, 1], [], []>, precision = #tpu.contract_precision<fp32>} : vector<48x16xf32>, vector<16x128xf32>, vector<48x128xf32> -> vector<48x128xf32>
    %126 = vector.shape_cast %125 : vector<48x128xf32> to vector<3x16x128xf32>
    %127 = vector.shape_cast %100 : vector<16x128xf32> to vector<1x16x128xf32>
    %128 = vector.broadcast %127 : vector<1x16x128xf32> to vector<3x16x128xf32>
    %129 = arith.mulf %126, %128 : vector<3x16x128xf32>
    %cst_31 = arith.constant dense<0.000000e+00> : vector<3x128xf32>
    %130 = vector.multi_reduction <add>, %129, %cst_31 [1] : vector<3x16x128xf32> to vector<3x128xf32>
    %131 = arith.subf %7, %76 : vector<2x128xf32>
    %132 = arith.mulf %131, %131 : vector<2x128xf32>
    %cst_32 = arith.constant dense<0.000000e+00> : vector<128xf32>
    %133 = vector.multi_reduction <add>, %132, %cst_32 [0] : vector<2x128xf32> to vector<128xf32>
    %134 = vector.shape_cast %133 : vector<128xf32> to vector<1x128xf32>
    %135 = vector.broadcast %8 : vector<1x128xf32> to vector<3x128xf32>
    %136 = arith.mulf %68, %135 : vector<3x128xf32>
    %137 = vector.broadcast %9 : vector<1x128xf32> to vector<3x128xf32>
    %138 = arith.mulf %130, %137 : vector<3x128xf32>
    %139 = arith.addf %136, %138 : vector<3x128xf32>
    %c0_33 = arith.constant 0 : index
    %c0_34 = arith.constant 0 : index
    %c0_35 = arith.constant 0 : index
    %140 = vector.load %arg6[%c0_33, %c0_34, %c0_35] : memref<1x3x128xf32, #tpu.memory_space<vmem>>, vector<1x3x128xf32>
    %141 = vector.shape_cast %140 : vector<1x3x128xf32> to vector<3x128xf32>
    %142 = vector.shape_cast %139 : vector<3x128xf32> to vector<1x3x128xf32>
    tpu.vector_store %arg6[%c0_33, %c0_34, %c0_35], %142 {strides = array<i32>} : memref<1x3x128xf32, #tpu.memory_space<vmem>>, vector<1x3x128xf32>,
    %c0_36 = arith.constant 0 : index
    %c0_37 = arith.constant 0 : index
    %c0_38 = arith.constant 0 : index
    %143 = vector.load %arg7[%c0_36, %c0_37, %c0_38] : memref<1x3x128xf32, #tpu.memory_space<vmem>>, vector<1x3x128xf32>
    %144 = vector.shape_cast %143 : vector<1x3x128xf32> to vector<3x128xf32>
    %145 = vector.shape_cast %68 : vector<3x128xf32> to vector<1x3x128xf32>
    tpu.vector_store %arg7[%c0_36, %c0_37, %c0_38], %145 {strides = array<i32>} : memref<1x3x128xf32, #tpu.memory_space<vmem>>, vector<1x3x128xf32>,
    %c0_39 = arith.constant 0 : index
    %c0_40 = arith.constant 0 : index
    %c0_41 = arith.constant 0 : index
    %146 = vector.load %arg8[%c0_39, %c0_40, %c0_41] : memref<1x3x128xf32, #tpu.memory_space<vmem>>, vector<1x3x128xf32>
    %147 = vector.shape_cast %146 : vector<1x3x128xf32> to vector<3x128xf32>
    %148 = vector.shape_cast %130 : vector<3x128xf32> to vector<1x3x128xf32>
    tpu.vector_store %arg8[%c0_39, %c0_40, %c0_41], %148 {strides = array<i32>} : memref<1x3x128xf32, #tpu.memory_space<vmem>>, vector<1x3x128xf32>,
    %c0_i32 = arith.constant 0 : i32
    %149 = arith.cmpi eq, %arg2, %c0_i32 : i32
    %150 = arith.extui %149 : i1 to i32
    %c0_i32_42 = arith.constant 0 : i32
    %151 = arith.cmpi ne, %150, %c0_i32_42 : i32
    scf.if %151 {
      %cst_49 = arith.constant 0.000000e+00 : f32
      %159 = vector.broadcast %cst_49 : f32 to vector<1x1x128xf32>
      %c0_50 = arith.constant 0 : index
      %c0_51 = arith.constant 0 : index
      %c0_52 = arith.constant 0 : index
      %160 = vector.load %arg9[%c0_50, %c0_51, %c0_52] : memref<1x1x128xf32, #tpu.memory_space<vmem>>, vector<1x1x128xf32>
      tpu.vector_store %arg9[%c0_50, %c0_51, %c0_52], %159 {strides = array<i32>} : memref<1x1x128xf32, #tpu.memory_space<vmem>>, vector<1x1x128xf32>,
    } else {
    }
    %c0_43 = arith.constant 0 : index
    %c0_44 = arith.constant 0 : index
    %c0_45 = arith.constant 0 : index
    %152 = vector.load %arg9[%c0_43, %c0_44, %c0_45] : memref<1x1x128xf32, #tpu.memory_space<vmem>>, vector<1x1x128xf32>
    %153 = vector.shape_cast %152 : vector<1x1x128xf32> to vector<1x128xf32>
    %154 = arith.addf %72, %134 : vector<1x128xf32>
    %155 = arith.addf %153, %154 : vector<1x128xf32>
    %c0_46 = arith.constant 0 : index
    %c0_47 = arith.constant 0 : index
    %c0_48 = arith.constant 0 : index
    %156 = vector.load %arg9[%c0_46, %c0_47, %c0_48] : memref<1x1x128xf32, #tpu.memory_space<vmem>>, vector<1x1x128xf32>
    %157 = vector.shape_cast %156 : vector<1x1x128xf32> to vector<1x128xf32>
    %158 = vector.shape_cast %155 : vector<1x128xf32> to vector<1x1x128xf32>
    tpu.vector_store %arg9[%c0_46, %c0_47, %c0_48], %158 {strides = array<i32>} : memref<1x1x128xf32, #tpu.memory_space<vmem>>, vector<1x1x128xf32>,
    return
  }
  func.func @transform_0(%arg0: i32, %arg1: i32, %arg2: i32) -> (i32, i32, i32) {
    %c2_i32 = arith.constant 2 : i32
    %0 = arith.muli %arg1, %c2_i32 : i32
    %1 = arith.addi %0, %arg2 : i32
    %c0_i32 = arith.constant 0 : i32
    %c0_i32_0 = arith.constant 0 : i32
    return %arg0, %c0_i32, %1 : i32, i32, i32
  }
  func.func @transform_1(%arg0: i32, %arg1: i32, %arg2: i32) -> (i32, i32, i32) {
    %c0_i32 = arith.constant 0 : i32
    %c0_i32_0 = arith.constant 0 : i32
    %c0_i32_1 = arith.constant 0 : i32
    return %arg0, %c0_i32, %c0_i32_0 : i32, i32, i32
  }
  func.func @transform_2(%arg0: i32, %arg1: i32, %arg2: i32) -> (i32, i32, i32) {
    %c0_i32 = arith.constant 0 : i32
    %c0_i32_0 = arith.constant 0 : i32
    %c0_i32_1 = arith.constant 0 : i32
    return %arg0, %c0_i32, %c0_i32_0 : i32, i32, i32
  }
  func.func @transform_3(%arg0: i32, %arg1: i32, %arg2: i32) -> (i32, i32, i32) {
    %c2_i32 = arith.constant 2 : i32
    %0 = arith.muli %arg1, %c2_i32 : i32
    %1 = arith.addi %0, %arg2 : i32
    %c0_i32 = arith.constant 0 : i32
    %c0_i32_0 = arith.constant 0 : i32
    return %arg0, %c0_i32, %1 : i32, i32, i32
  }
  func.func @transform_4(%arg0: i32, %arg1: i32, %arg2: i32) -> (i32, i32, i32) {
    %c2_i32 = arith.constant 2 : i32
    %0 = arith.muli %arg1, %c2_i32 : i32
    %1 = arith.addi %0, %arg2 : i32
    %c0_i32 = arith.constant 0 : i32
    %c0_i32_0 = arith.constant 0 : i32
    return %arg0, %c0_i32, %1 : i32, i32, i32
  }
  func.func @transform_5(%arg0: i32, %arg1: i32, %arg2: i32) -> (i32, i32, i32) {
    %c2_i32 = arith.constant 2 : i32
    %0 = arith.muli %arg1, %c2_i32 : i32
    %1 = arith.addi %0, %arg2 : i32
    %c0_i32 = arith.constant 0 : i32
    %c0_i32_0 = arith.constant 0 : i32
    return %arg0, %c0_i32, %1 : i32, i32, i32
  }
  func.func @transform_6(%arg0: i32, %arg1: i32, %arg2: i32) -> (i32, i32, i32) {
    %c1_i32 = arith.constant 1 : i32
    %0 = arith.muli %arg0, %c1_i32 : i32
    %1 = arith.addi %0, %arg1 : i32
    %c0_i32 = arith.constant 0 : i32
    %c0_i32_0 = arith.constant 0 : i32
    %c0_i32_1 = arith.constant 0 : i32
    return %1, %c0_i32, %c0_i32_0 : i32, i32, i32
  }
}

</mosaic_0001>

<bundles_post_ra>
// kernel: tpu_custom_call.1
= control target key start
LH: loop header
LB: loop body
LE: loop exit
PB: predicated region body
PF: predicated region fallthrough
CT: control target
= control target key end

     0   :  { %12 = vsyncpa [#allocation3], 0  ;;  %s3427_s0 = inlined_call_operand.vmem [shape: f32[2,6,256], index: 0, kind: input, shape index: {}]   ;;  %s3428_s1 = inlined_call_operand.vmem [shape: f32[2,48,16], index: 1, kind: input, shape index: {}]   ;;  %s3429_s2 = inlined_call_operand.vmem [shape: f32[2,48,16], index: 2, kind: input, shape index: {}]   ;;  %s3430_s3 = inlined_call_operand.vmem [shape: f32[2,3,256], index: 3, kind: output, shape index: {0}]   ;;  %s3431_s4 = inlined_call_operand.vmem [shape: f32[2,3,256], index: 4, kind: output, shape index: {1}]   ;;  %s3432_s5 = inlined_call_operand.vmem [shape: f32[2,3,256], index: 5, kind: output, shape index: {2}]   ;;  %s3433_s6 = inlined_call_operand.hbm [shape: f32[2,1,128], index: 6, kind: output, shape index: {3}]  }
   0x1   :  { %14 = vsyncpa [#allocation3 + $0x1], 0  ;;  %s2929_s21 = smov 0   ;;  %s2931_s22 = smov 0  }
   0x2   :  { %s2933_s23 = smov 0   ;;  %s2935_s24 = smov 0  }
   0x3   :  { %s2937_s25 = smov 0   ;;  %s2939_s26 = smov 0  }
   0x4   :  { %s2941_s27 = smov 0   ;;  %s2943_s28 = smov 0  }
   0x5 LB: > { %s2340_s29 = sadd.s32 4294967295, %s2890_s28   ;;  %s2341_s30 = sadd.s32 4294967294, %s2890_s28   ;;  %s2890_s28 = sphi %s2943_s28, %s20_s28   ;;  %s2886_s27 = sphi %s2941_s27, %s3449_s27   ;;  %s2882_s26 = sphi %s2939_s26, %s3448_s26   ;;  %s2878_s25 = sphi %s2937_s25, %s3447_s25   ;;  %s2874_s24 = sphi %s2935_s24, %s3446_s24   ;;  %s2870_s23 = sphi %s2933_s23, %s3445_s23   ;;  %s2866_s22 = sphi %s2931_s22, %s3444_s22   ;;  %s2862_s21 = sphi %s2929_s21, %s3443_s21  }
   0x6   : > { %s32_s7 = sadd.s32 1, %s2882_s26  ;;  %s39_s8 = sadd.s32 1, %s2886_s27 }
   0x7   : > { %p33_p0 = scmp.ge.s32.totalorder %s32_s7, 2  ;;  %p238_p1 = scmp.ne.s32.totalorder %s2870_s23, %s2866_s22 }
   0x8   : > { %p239_p2 = scmp.eq.s32.totalorder %s2340_s29, 3  ;;  %p244_p4 = scmp.ne.s32.totalorder %s2866_s22, %s2862_s21 }
   0x9   : > { %s3451_s7 = smov (%p33_p0, %s32_s7), 0  ;;  %s3453_s8 = smov (!%p33_p0, %s39_s8), %s2886_s27 }
   0xa   : > { %p2978_p3 = por %p239_p2, %p238_p1  ;;  %p41_p5 = scmp.ge.s32.totalorder %s3453_s8, 2 }
   0xb   : > { %p245_p6 = scmp.eq.s32.totalorder %s2341_s30, 3  ;;  %p2344_p7 = scmp.ge.s32.totalorder %s2890_s28, 1 }
   0xc   : > { %p294_p8 = scmp.lt.s32.totalorder %s2890_s28, 5  ;;  %s3455_s8 = smov (%p41_p5, %s3453_s8), 0 }
   0xd   : > { %3437 = sst [smem:[#allocation5_spill]] %s3455_s8  ;;  %p2988_p9 = por %p245_p6, %p244_p4 }
   0xe   : > { %p295_p10 = pnand %p2344_p7, %p294_p8  ;;  %s225_s11 = ssub.s32 %s2886_s27, %s3455_s8 }
   0xf   : > { %s228_s12 = sadd.s32 1, %s2870_s23  ;;  %p226_p11 = scmp.eq.s32.totalorder %s225_s11, 0  ;;  %v440_v0 = vlaneseq (!%p295_p10)  ;;  %vm505_vm0 = vcmask (!%p295_p10), 130048   ;;  %vm1227_vm1 = vcmask (!%p295_p10), 1041408  }
  0x10   : > { %298 = sbr.rel (%p295_p10) target bundleno = 396 (0x18c), region = 32  ;;  %p370_p12 = scmp.lt.s32.totalorder (!%p295_p10), %s2878_s25, 1 }
  0x11   : > { %s2996_s13 = scalar_select %p226_p11, %s2870_s23, %s228_s12  }
  0x12   : > { %p372_p13 = scmp.lt.s32.totalorder (!%p295_p10), %s2874_s24, 1  ;;  %v3003_v1 = vshrl.u32 (!%p295_p10), %v440_v0, 7  ;;  %p2355_p0 = scmp.ne.s32.totalorder (!%p295_p10), %s2874_s24, 0 }
  0x14   : > { %v3017_v2 = vadd.s32 (!%p295_p10), 8, %v3003_v1  ;;  %v481_v3 = vsub.s32 (!%p295_p10), 1, %v3003_v1  ;;  %v3021_v4 = vsub.s32 (!%p295_p10), 3, %v3003_v1 }
  0x17   : > { %s371_s15 = scalar_select %p370_p12, %s2878_s25, 1 }
  0x18   : > { %s373_s16 = scalar_select %p372_p13, %s2874_s24, 1 }
  0x19   : > { %s2345_s17 = sshll.u32 %s371_s15, 1  ;;  %s2719_s18 = smul.u32 48, %s371_s15 }
  0x1a   : > { %s3005_s19 = sadd.s32 %s2345_s17, %s373_s16  ;;  %s3440_s16 = sand.u32 1, %s2866_s22  }
  0x1b   : > { %s2346_s20 = sshll.u32 %s3005_s19, 3  ;;  %s3011_s11 = scalar_lea.vmem %s3428_s1, %s2719_s18 }
  0x1c   : > { %s377_s8 = scalar_lea.vmem %s3427_s0, %s2346_s20  ;;  %v428_v5 = vld [vmem:[%s3011_s11] sm:$0xff]  ;;  %s3027_s17 = scalar_lea.vmem %s3429_s2, %s2719_s18  ;;  %v429_v6 = vld [vmem:[%s3011_s11 + $0x8] sm:$0xff]  ;;  %v430_v7 = vld [vmem:[%s3011_s11 + $0x10] sm:$0xff] }
  0x1d   : > { %v3031_v8 = vld [vmem:[%s377_s8] sm:$0x3f]  ;;  %v507_v9 = vsel %vm505_vm0, %v428_v5, 0  ;;  %v510_v11 = vsel %vm505_vm0, %v429_v6, 0  ;;  %v435_v12 = vld [vmem:[%s3027_s17 + $0x8] sm:$0xff]  ;;  %v436_v17 = vld [vmem:[%s3027_s17 + $0x10] sm:$0xff] }
  0x1e   : > { %v434_v10 = vld [vmem:[%s3027_s17] sm:$0xff]  ;;  %v443_v13 = vmax.f32 %v3031_v8, 0.001  ;;  %v3038_v14 = vand.u32 4294901760, %v507_v9  ;;  %v3041_v16 = vand.u32 4294901760, %v510_v11  ;;  %v1291_v19 = vsel %vm505_vm0, %v435_v12, 0 }
  0x1f   : > { %v1288_v15 = vsel %vm505_vm0, %v434_v10, 0  ;;  %v513_v20 = vsel %vm505_vm0, %v430_v7, 0  ;;  %v3049_v21 = vsel %vm505_vm0, %v436_v17, 0  ;;  %v431_v22 = vld [vmem:[%s3011_s11 + $0x18] sm:$0xff]  ;;  %v3058_v26 = vand.u32 4294901760, %v1291_v19  ;;  %s2350_s8 = sshll.u32 %s3005_s19, 2 }
  0x20   : > { %v3044_v18 = vand.u32 4294901760, %v1288_v15  ;;  %v444_v23 = vmin.f32 %v443_v13, 14.999  ;;  %v3053_v24 = vsub.f32 %v507_v9, %v3038_v14  ;;  %v3056_v25 = vsub.f32 %v510_v11, %v3041_v16  ;;  %s411_s20 = scalar_lea.vmem %s3431_s4, %s2350_s8  ;;  %s399_s15 = scalar_lea.vmem %s3430_s3, %s2350_s8 }
  0x21   : > { %v3063_v28 = vand.u32 4294901760, %v513_v20  ;;  %v3066_v29 = vand.u32 4294901760, %v3049_v21  ;;  %v3069_v30 = vsel %vm505_vm0, %v431_v22, 0  ;;  %v3076_v37 = vsub.f32 %v1291_v19, %v3058_v26 }
  0x22   : > { %v3061_v27 = vsub.f32 %v1288_v15, %v3044_v18  ;;  %v445_v31 = vfloor.f32 %v444_v23  ;;  %v446_v32 = vceil.f32 %v444_v23  ;;  %v1225_v33 = vsub.f32 %v3031_v8, %v444_v23 }
  0x23   : > { %v593_v34 = vand.u32 4294901760, %v3053_v24  ;;  %v603_v36 = vand.u32 4294901760, %v3056_v25  ;;  %v3079_v38 = vsub.f32 %v513_v20, %v3063_v28 }
  0x24   : > { %v1374_v35 = vand.u32 4294901760, %v3061_v27  ;;  %v447_v39 = vsub.f32 %v444_v23, %v445_v31  ;;  %v449_v40 = vsub.f32 %v446_v32, %v444_v23  ;;  %v2720_v41 = vtrunc.f32 %v445_v31 }
  0x25   : > { %v2722_v42 = vtrunc.f32 %v446_v32  ;;  %v1226_v43 = vmul.f32 %v1225_v33, %v1225_v33  ;;  %v594_v44 = vsub.f32 %v3053_v24, %v593_v34  ;;  %v3090_v46 = vsub.f32 %v3056_v25, %v603_v36 }
  0x26   : > { %v1375_v45 = vsub.f32 %v3061_v27, %v1374_v35  ;;  %v3092_v47 = vsub.f32 1.0, %v447_v39  ;;  %v3094_v48 = vsub.f32 1.0, %v449_v40  ;;  %v3096_v49 = vcvt.f32.s32 %v2720_v41 }
  0x27   : > { %v3098_v50 = vcvt.f32.s32 %v2722_v42  ;;  %v1228_v51 = vsel %vm1227_vm1, %v1226_v43, 0.0  ;;  %v2007_v52 = vrot.slane %v1226_v43, 2  ;;  %v595_v53 = vand.u32 4294901760, %v594_v44 }
  0x28   : > { %v1376_v54 = vand.u32 4294901760, %v1375_v45  ;;  %v482_v55 = vrot.slane %v3096_v49, %v481_v3  ;;  %v488_v56 = vrot.slane %v3092_v47, %v481_v3  ;;  %v500_v58 = vrot.slane %v3094_v48, %v481_v3 }
  0x29   : > { %v494_v57 = vrot.slane %v3098_v50, %v481_v3  ;;  %v1229_v59 = vrot.slane %v1228_v51, 4  ;;  %v2009_v60 = vsel %vm1227_vm1, %v2007_v52, 0.0  ;;  %v1264_v61 = vrot.slane %v3096_v49, %v3021_v4  ;;  %2459 = vmatprep.mubr.f32.mxu0 %v595_v53 }
  0x2a   : > { %v1270_v62 = vrot.slane %v3092_v47, %v3021_v4  ;;  %2537 = vmatprep.mubr.f32.mxu1 %v1376_v54  ;;  %vm483_vm2 = vcmp.eq.s32.totalorder %v3003_v1, %v482_v55  ;;  %vm484_vm3 = vcmp.eq.s32.totalorder %v3017_v2, %v482_v55  ;;  %v2010_v10 = vrot.slane %v2009_v60, 4 }
  0x2b   : > { %vm495_vm4 = vcmp.eq.s32.totalorder %v3003_v1, %v494_v57  ;;  %vm496_vm5 = vcmp.eq.s32.totalorder %v3017_v2, %v494_v57  ;;  %v489_v63 = vsel %vm483_vm2, %v488_v56, 0.0  ;;  %v490_v0 = vsel %vm484_vm3, %v488_v56, 0.0 }
  0x2c   : > { %v501_v3 = vsel %vm495_vm4, %v500_v58, 0.0  ;;  %v502_v5 = vsel %vm496_vm5, %v500_v58, 0.0  ;;  %v1230_v9 = vadd.f32 %v1229_v59, %v1228_v51  ;;  %vm1265_vm6 = vcmp.eq.s32.totalorder %v3003_v1, %v1264_v61  ;;  %v437_v58 = vld [vmem:[%s3027_s17 + $0x18] sm:$0xff] }
  0x2d   : > { %v503_v6 = vadd.f32 %v501_v3, %v489_v63  ;;  %v504_v7 = vadd.f32 %v502_v5, %v490_v0  ;;  %vm1266_vm7 = vcmp.eq.s32.totalorder %v3017_v2, %v1264_v61  ;;  %v1276_v11 = vrot.slane %v3098_v50, %v3021_v4  ;;  %v432_v5 = vld [vmem:[%s3011_s11 + $0x20] sm:$0xff] }
  0x2e   : > { %v1282_v12 = vrot.slane %v3094_v48, %v3021_v4  ;;  %v1231_v17 = vrot.slane %v1230_v9, 2  ;;  %v2011_v19 = vadd.f32 %v2010_v10, %v2009_v60  ;;  %v1271_v20 = vsel %vm1265_vm6, %v1270_v62, 0.0 }
  0x2f   : > { %v525_v13 = vand.u32 4294901760, %v503_v6  ;;  %v528_v15 = vand.u32 4294901760, %v504_v7  ;;  %v1272_v22 = vsel %vm1266_vm7, %v1270_v62, 0.0  ;;  %vm1277_vm8 = vcmp.eq.s32.totalorder %v3003_v1, %v1276_v11 }
  0x30   : > { %vm1278_vm9 = vcmp.eq.s32.totalorder %v3017_v2, %v1276_v11  ;;  %v1232_v31 = vadd.f32 %v1231_v17, %v1230_v9  ;;  %v2012_v32 = vrot.slane %v2011_v19, 2  ;;  %v1283_v33 = vsel %vm1277_vm8, %v1282_v12, 0.0 }
  0x31   : > { %v3122_v23 = vpack.c.bf16 %v528_v15, %v525_v13  ;;  %v1284_v39 = vsel %vm1278_vm9, %v1282_v12, 0.0  ;;  %v1285_v40 = vadd.f32 %v1283_v33, %v1271_v20  ;;  %v605_v41 = vand.u32 4294901760, %v3090_v46 }
  0x32   : > { %v1384_v4 = vand.u32 4294901760, %v3076_v37  ;;  %v1233_v42 = vrot.slane %v1232_v31, 1  ;;  %v2013_v43 = vadd.f32 %v2012_v32, %v2011_v19  ;;  %v1286_v44 = vadd.f32 %v1284_v39, %v1272_v22 }
  0x33   : > { %2612 = vmatprep.subr.bf16.mxu0 %v3122_v23  ;;  %v613_v45 = vand.u32 4294901760, %v3079_v38  ;;  %v1306_v51 = vand.u32 4294901760, %v1285_v40  ;;  %v3134_v46 = vsub.f32 %v3049_v21, %v3066_v29  ;;  %v3137_v53 = vand.u32 4294901760, %v3069_v30 }
  0x34   : > { %2614 = vmatpush3.bf16.msra.mxu0 %v3122_v23  ;;  %v1385_v52 = vsub.f32 %v3076_v37, %v1384_v4  ;;  %v3139_v54 = vadd.f32 %v1233_v42, %v1232_v31  ;;  %v2014_v55 = vrot.slane %v2013_v43, 1  ;;  %v1309_v56 = vand.u32 4294901760, %v1286_v44 }
  0x35   : > { %v614_v57 = vsub.f32 %v3079_v38, %v613_v45  ;;  %v1394_v60 = vand.u32 4294901760, %v3134_v46  ;;  %v3148_v21 = vsub.f32 %v3069_v30, %v3137_v53  ;;  %v3150_v61 = vsub.f32 %v503_v6, %v525_v13 }
  0x36   : > { %v1386_v59 = vand.u32 4294901760, %v1385_v52  ;;  %v3152_v62 = vadd.f32 %v2014_v55, %v2013_v43  ;;  %v3154_v63 = vpack.c.bf16 %v1309_v56, %v1306_v51  ;;  %v3156_v3 = vsub.f32 %v504_v7, %v528_v15  ;;  %v438_v15 = vld [vmem:[%s3027_s17 + $0x20] sm:$0xff] }
  0x37   : > { %2460 = vmatmul.mubr.f32.vlgmr.msra.gmra.mrb[0].mxu0 %v605_v41  ;;  %v615_v0 = vand.u32 4294901760, %v614_v57  ;;  %v1395_v9 = vsub.f32 %v3134_v46, %v1394_v60  ;;  %v623_v10 = vand.u32 4294901760, %v3148_v21  ;;  %v654_v30 = vand.u32 4294901760, %v3150_v61  ;;  %v439_v41 = vld [vmem:[%s3027_s17 + $0x28] sm:$0xff]  ;;  %s367_s17 = scalar_lea.vmem [#allocation2], %s3440_s16 }
  0x38   : > { %v1297_v6 = vsel %vm505_vm0, %v437_v58, 0  ;;  %2636 = vmatprep.subr.bf16.mxu1 %v3154_v63  ;;  %v661_v11 = vand.u32 4294901760, %v3156_v3  ;;  %v3169_v12 = vsub.f32 %v1285_v40, %v1306_v51  ;;  %v3171_v13 = vsub.f32 %v1286_v44, %v1309_v56  ;;  %v433_v40 = vld [vmem:[%s3011_s11 + $0x28] sm:$0xff]  ;;  %s423_s11 = scalar_lea.vmem %s3432_s5, %s2350_s8 }
  0x39   : > { %2462 = vmatprep.mubr.f32.mxu0 %v615_v0  ;;  %v3167_v7 = vand.u32 4294901760, %v1297_v6  ;;  %2638 = vmatpush3.bf16.msra.mxu1 %v3154_v63  ;;  %v1396_v17 = vand.u32 4294901760, %v1395_v9  ;;  %v624_v19 = vsub.f32 %v3148_v21, %v623_v10  ;;  %v655_v20 = vsub.f32 %v3150_v61, %v654_v30 }
  0x3a   : > { %v519_v22 = vsel %vm505_vm0, %v432_v5, 0  ;;  %v662_v31 = vsub.f32 %v3156_v3, %v661_v11  ;;  %v1435_v33 = vand.u32 4294901760, %v3169_v12  ;;  %v1442_v39 = vand.u32 4294901760, %v3171_v13 }
  0x3b   : > { %v3186_v32 = vsub.f32 %v1297_v6, %v3167_v7  ;;  %v625_v42 = vand.u32 4294901760, %v624_v19  ;;  %v656_v43 = vand.u32 4294901760, %v655_v20  ;;  %v3192_v44 = vand.u32 4294901760, %v519_v22 }
  0x3c   : > { %v1300_v51 = vsel %vm505_vm0, %v438_v15, 0  ;;  %2538 = vmatmul.mubr.f32.vlgmr.msra.gmra.mrb[0].mxu1 %v1386_v59  ;;  %v663_v52 = vand.u32 4294901760, %v662_v31  ;;  %v1436_v56 = vsub.f32 %v3169_v12, %v1435_v33  ;;  %v1443_v57 = vsub.f32 %v3171_v13, %v1442_v39 }
  0x3d   : > { %v1404_v55 = vand.u32 4294901760, %v3186_v32  ;;  %2540 = vmatprep.mubr.f32.mxu1 %v1396_v17  ;;  %2463 = vmatmul.mubr.f32.gmra.mrb[2].mxu0 %v625_v42  ;;  %v3203_v58 = vsub.f32 %v519_v22, %v3192_v44  ;;  %v3205_v0 = vand.u32 4294901760, %v1300_v51  ;;  %v522_v59 = vsel %vm505_vm0, %v433_v40, 0 }
  0x3e   : > { %v1303_v5 = vsel %vm505_vm0, %v439_v41, 0  ;;  %v2615_v9 = vpack.c.bf16 %v663_v52, %v656_v43  ;;  %v1437_v15 = vand.u32 4294901760, %v1436_v56  ;;  %v1444_v19 = vand.u32 4294901760, %v1443_v57 }
  0x3f   : > { %v1405_v6 = vsub.f32 %v3186_v32, %v1404_v55  ;;  %v3435_v20 = vand.u32 4294901760, %v3203_v58  ;;  %v3214_v17 = vsub.f32 %v1300_v51, %v3205_v0  ;;  %v3216_v22 = vand.u32 4294901760, %v522_v59 }
  0x40   : > { %v3218_v31 = vand.u32 4294901760, %v1303_v5  ;;  %2616 = vmatprep.subr.bf16.mxu0 %v2615_v9  ;;  %v2639_v42 = vpack.c.bf16 %v1444_v19, %v1437_v15  ;;  %v2619_v41 = vpack.c.bf16 %v3156_v3, %v3150_v61  ;;  %v2643_v43 = vpack.c.bf16 %v3171_v13, %v3169_v12 }
  0x41   : > { %v1406_v40 = vand.u32 4294901760, %v1405_v6  ;;  %2618 = vmatpush3.bf16.msra.mxu0 %v2615_v9  ;;  %v634_v52 = vsub.f32 %v3203_v58, %v3435_v20  ;;  %v1414_v51 = vand.u32 4294901760, %v3214_v17  ;;  %v3229_v56 = vsub.f32 %v522_v59, %v3216_v22 }
  0x42   : > { %v3232_v57 = vsub.f32 %v1303_v5, %v3218_v31  ;;  %2640 = vmatprep.subr.bf16.mxu1 %v2639_v42  ;;  %2620 = vmatprep.subr.bf16.mxu0 %v2619_v41  ;;  %vm2037_vm2 = vcmask 1041409   ;;  %vm2040_vm3 = vcmask 1042434  }
  0x43   : > { %2541 = vmatmul.mubr.f32.gmra.mrb[2].mxu1 %v1406_v40  ;;  %v635_v6 = vand.u32 4294901760, %v634_v52  ;;  %v1415_v9 = vsub.f32 %v3214_v17, %v1414_v51  ;;  %v643_v15 = vand.u32 4294901760, %v3229_v56 }
  0x44   : > { %2642 = vmatpush3.bf16.msra.mxu1 %v2639_v42  ;;  %v1424_v19 = vand.u32 4294901760, %v3232_v57 }
  0x45   : > { %2644 = vmatprep.subr.bf16.mxu1 %v2643_v43  ;;  %2465 = vmatprep.mubr.f32.mxu0 %v635_v6  ;;  %v1416_v59 = vand.u32 4294901760, %v1415_v9  ;;  %v644_v20 = vsub.f32 %v3229_v56, %v643_v15  ;;  %v2025_v6 = vsub.s32 5, %v3003_v1 }
  0x46   : > { %v1425_v5 = vsub.f32 %v3232_v57, %v1424_v19 }
  0x47   : > { %2543 = vmatprep.mubr.f32.mxu1 %v1416_v59  ;;  %v645_v40 = vand.u32 4294901760, %v644_v20  ;;  %v2627_v20 = vpack.c.bf16 %v661_v11, %v654_v30 }
  0x48   : > { %v1426_v42 = vand.u32 4294901760, %v1425_v5 }
  0x49   : > { %2466 = vmatmul.mubr.f32.gmra.mrb[4].mxu0 %v645_v40 }
  0x4a   : > { %2544 = vmatmul.mubr.f32.gmra.mrb[4].mxu1 %v1426_v42  ;;  %2472 = vmatprep.mubr.f32.mxu0 %v3038_v14 }
  0x4b   : > { %2550 = vmatprep.mubr.f32.mxu1 %v3044_v18 }
  0x4d   : > { %2473 = vmatmul.mubr.f32.vlgmr.msra.gmra.mrb[0].mxu0 %v3041_v16 }
  0x4e   : > { %2551 = vmatmul.mubr.f32.vlgmr.msra.gmra.mrb[0].mxu1 %v3058_v26  ;;  %2475 = vmatprep.mubr.f32.mxu0 %v3063_v28 }
  0x4f   : > { %2553 = vmatprep.mubr.f32.mxu1 %v3066_v29  ;;  %2622 = vmatpush3.bf16.msra.mxu0 %v2619_v41  ;;  %v2651_v41 = vpack.c.bf16 %v1442_v39, %v1435_v33 }
  0x50   : > { %2646 = vmatpush3.bf16.msra.mxu1 %v2643_v43  ;;  %2624 = vmatprep.subr.bf16.mxu0 %v3122_v23 }
  0x51   : > { %2648 = vmatprep.subr.bf16.mxu1 %v3154_v63  ;;  %2476 = vmatmul.mubr.f32.gmra.mrb[2].mxu0 %v3137_v53 }
  0x52   : > { %2554 = vmatmul.mubr.f32.gmra.mrb[2].mxu1 %v3167_v7  ;;  %2478 = vmatprep.mubr.f32.mxu0 %v3192_v44 }
  0x53   : > { %2556 = vmatprep.mubr.f32.mxu1 %v3205_v0 }
  0x55   : > { %2479 = vmatmul.mubr.f32.gmra.mrb[4].mxu0 %v3216_v22 }
  0x56   : > { %2557 = vmatmul.mubr.f32.gmra.mrb[4].mxu1 %v3218_v31  ;;  %2485 = vmatprep.mubr.f32.mxu0 %v3053_v24  ;;  %v3439_v24 = vand.u32 4294901760, %v3203_v58 }
  0x57   : > { %2563 = vmatprep.mubr.f32.mxu1 %v3061_v27 }
  0x59   : > { %2486 = vmatmul.mubr.f32.vlgmr.msra.gmra.mrb[0].mxu0 %v3056_v25 }
  0x5a   : > { %2564 = vmatmul.mubr.f32.vlgmr.msra.gmra.mrb[0].mxu1 %v3076_v37  ;;  %2488 = vmatprep.mubr.f32.mxu0 %v3079_v38 }
  0x5b   : > { %2566 = vmatprep.mubr.f32.mxu1 %v3134_v46  ;;  %2626 = vmatpush3.bf16.msra.mxu0 %v3122_v23 }
  0x5c   : > { %2650 = vmatpush3.bf16.msra.mxu1 %v3154_v63  ;;  %2628 = vmatprep.subr.bf16.mxu0 %v2627_v20 }
  0x5d   : > { %2652 = vmatprep.subr.bf16.mxu1 %v2651_v41  ;;  %2489 = vmatmul.mubr.f32.gmra.mrb[2].mxu0 %v3148_v21 }
  0x5e   : > { %2567 = vmatmul.mubr.f32.gmra.mrb[2].mxu1 %v3186_v32  ;;  %2491 = vmatprep.mubr.f32.mxu0 %v3203_v58 }
  0x5f   : > { %2569 = vmatprep.mubr.f32.mxu1 %v3214_v17 }
  0x61   : > { %2492 = vmatmul.mubr.f32.gmra.mrb[4].mxu0 %v3229_v56 }
  0x62   : > { %2570 = vmatmul.mubr.f32.gmra.mrb[4].mxu1 %v3232_v57  ;;  %2498 = vmatprep.mubr.f32.mxu0 %v593_v34  ;;  %v2018_v57 = vsub.s32 4, %v3003_v1 }
  0x63   : > { %2576 = vmatprep.mubr.f32.mxu1 %v1374_v35 }
  0x65   : > { %2499 = vmatmul.mubr.f32.vlgmr.msra.gmra.mrb[0].mxu0 %v603_v36 }
  0x66   : > { %2577 = vmatmul.mubr.f32.vlgmr.msra.gmra.mrb[0].mxu1 %v1384_v4  ;;  %2501 = vmatprep.mubr.f32.mxu0 %v613_v45 }
  0x67   : > { %2579 = vmatprep.mubr.f32.mxu1 %v1394_v60  ;;  %2630 = vmatpush3.bf16.msra.mxu0 %v2627_v20 }
  0x68   : > { %2654 = vmatpush3.bf16.msra.mxu1 %v2651_v41  ;;  %2632 = vmatprep.subr.bf16.mxu0 %v3122_v23 }
  0x69   : > { %2656 = vmatprep.subr.bf16.mxu1 %v3154_v63  ;;  %2502 = vmatmul.mubr.f32.gmra.mrb[2].mxu0 %v623_v10 }
  0x6a   : > { %2580 = vmatmul.mubr.f32.gmra.mrb[2].mxu1 %v1404_v55  ;;  %2504 = vmatprep.mubr.f32.mxu0 %v3439_v24 }
  0x6b   : > { %2582 = vmatprep.mubr.f32.mxu1 %v1414_v51 }
  0x6d   : > { %2505 = vmatmul.mubr.f32.gmra.mrb[4].mxu0 %v643_v15 }
  0x6e   : > { %2583 = vmatmul.mubr.f32.gmra.mrb[4].mxu1 %v1424_v19  ;;  %2511 = vmatprep.mubr.f32.mxu0 %v3038_v14 }
  0x6f   : > { %2589 = vmatprep.mubr.f32.mxu1 %v3044_v18 }
  0x71   : > { %2512 = vmatmul.mubr.f32.vlgmr.msra.gmra.mrb[0].mxu0 %v3041_v16 }
  0x72   : > { %2590 = vmatmul.mubr.f32.vlgmr.msra.gmra.mrb[0].mxu1 %v3058_v26  ;;  %2514 = vmatprep.mubr.f32.mxu0 %v3063_v28 }
  0x73   : > { %2592 = vmatprep.mubr.f32.mxu1 %v3066_v29  ;;  %2634 = vmatpush3.bf16.msra.mxu0 %v3122_v23 }
  0x74   : > { %2658 = vmatpush3.bf16.msra.mxu1 %v3154_v63 }
  0x75   : > { %2515 = vmatmul.mubr.f32.gmra.mrb[2].mxu0 %v3137_v53 }
  0x76   : > { %2593 = vmatmul.mubr.f32.gmra.mrb[2].mxu1 %v3167_v7  ;;  %2517 = vmatprep.mubr.f32.mxu0 %v3192_v44 }
  0x77   : > { %2595 = vmatprep.mubr.f32.mxu1 %v3205_v0 }
  0x79   : > { %2518 = vmatmul.mubr.f32.gmra.mrb[4].mxu0 %v3216_v22 }
  0x7a   : > { %2596 = vmatmul.mubr.f32.gmra.mrb[4].mxu1 %v3218_v31  ;;  %2524 = vmatprep.mubr.f32.mxu0 %v3038_v14  ;;  %v454_v14 = vsub.s32 0, %v3003_v1 }
  0x7b   : > { %2602 = vmatprep.mubr.f32.mxu1 %v3044_v18 }
  0x7c   : > { %v455_v18 = vrot.slane %v3096_v49, %v454_v14  ;;  %v468_v25 = vrot.slane %v3098_v50, %v454_v14 }
  0x7d   : > { %2525 = vmatmul.mubr.f32.vlgmr.msra.gmra.mrb[0].mxu0 %v3041_v16  ;;  %v1237_v16 = vsub.s32 2, %v3003_v1 }
  0x7e   : > { %2603 = vmatmul.mubr.f32.vlgmr.msra.gmra.mrb[0].mxu1 %v3058_v26  ;;  %2527 = vmatprep.mubr.f32.mxu0 %v3063_v28  ;;  %v461_v28 = vrot.slane %v3092_v47, %v454_v14  ;;  %vm457_vm10 = vcmp.eq.s32.totalorder %v3017_v2, %v455_v18  ;;  %vm470_vm11 = vcmp.eq.s32.totalorder %v3017_v2, %v468_v25 }
  0x7f   : > { %2605 = vmatprep.mubr.f32.mxu1 %v3066_v29  ;;  %v1238_v26 = vrot.slane %v3096_v49, %v1237_v16  ;;  %v1250_v27 = vrot.slane %v3098_v50, %v1237_v16  ;;  %v474_v29 = vrot.slane %v3094_v48, %v454_v14  ;;  %v1244_v34 = vrot.slane %v3092_v47, %v1237_v16 }
  0x80   : > { %v1256_v35 = vrot.slane %v3094_v48, %v1237_v16  ;;  %vm456_vm14 = vcmp.eq.s32.totalorder %v3003_v1, %v455_v18  ;;  %vm469_vm15 = vcmp.eq.s32.totalorder %v3003_v1, %v468_v25  ;;  %v463_v36 = vsel %vm457_vm10, %v461_v28, 0.0 }
  0x81   : > { %2528 = vmatmul.mubr.f32.gmra.mrb[2].mxu0 %v3137_v53  ;;  %vm1240_vm12 = vcmp.eq.s32.totalorder %v3017_v2, %v1238_v26  ;;  %vm1252_vm13 = vcmp.eq.s32.totalorder %v3017_v2, %v1250_v27  ;;  %vm1239_vm0 = vcmp.eq.s32.totalorder %v3003_v1, %v1238_v26  ;;  %vm1251_vm1 = vcmp.eq.s32.totalorder %v3003_v1, %v1250_v27 }
  0x82   : > { %2606 = vmatmul.mubr.f32.gmra.mrb[2].mxu1 %v3167_v7  ;;  %2530 = vmatprep.mubr.f32.mxu0 %v3192_v44  ;;  %v476_v37 = vsel %vm470_vm11, %v474_v29, 0.0  ;;  %v1246_v38 = vsel %vm1240_vm12, %v1244_v34, 0.0  ;;  %v1258_v47 = vsel %vm1252_vm13, %v1256_v35, 0.0  ;;  %v462_v48 = vsel %vm456_vm14, %v461_v28, 0.0 }
  0x83   : > { %2608 = vmatprep.mubr.f32.mxu1 %v3205_v0  ;;  %v475_v49 = vsel %vm469_vm15, %v474_v29, 0.0  ;;  %v1245_v50 = vsel %vm1239_vm0, %v1244_v34, 0.0  ;;  %v1257_v23 = vsel %vm1251_vm1, %v1256_v35, 0.0  ;;  %v478_v4 = vadd.f32 %v476_v37, %v463_v36 }
  0x84   : > { %v1260_v45 = vadd.f32 %v1258_v47, %v1246_v38  ;;  %v477_v46 = vadd.f32 %v475_v49, %v462_v48  ;;  %v1259_v2 = vadd.f32 %v1257_v23, %v1245_v50  ;;  %v2019_v26 = vrot.slane %v3031_v8, %v2018_v57 }
  0x85   : > { %2531 = vmatmul.mubr.f32.gmra.mrb[4].mxu0 %v3216_v22  ;;  %v2026_v27 = vrot.slane %v3031_v8, %v2025_v6 }
  0x86   : > { %2609 = vmatmul.mubr.f32.gmra.mrb[4].mxu1 %v3218_v31 }
 0x150   : > { %v2526_v53 = vpop.f32.mrb[0].mxu0 }
 0x151   : > { %v2604_v60 = vpop.f32.mrb[0].mxu1  ;;  %v1199_v21 = vmul.f32 %v2526_v53, %v478_v4  ;;  %v1164_v63 = vpop.f32.mrb[1].mxu0 }
 0x152   : > { %v1980_v61 = vmul.f32 %v2604_v60, %v1260_v45  ;;  %v1945_v3 = vpop.f32.mrb[1].mxu1  ;;  %v1198_v10 = vmul.f32 %v1164_v63, %v477_v46 }
 0x153   : > { %v1979_v30 = vmul.f32 %v1945_v3, %v1259_v2 }
 0x154   : > { %v1204_v11 = vadd.f32 %v1199_v21, %v1198_v10  ;;  %v2529_v12 = vpop.f32.mrb[2].mxu0 }
 0x155   : > { %v1985_v7 = vadd.f32 %v1980_v61, %v1979_v30  ;;  %v2607_v13 = vpop.f32.mrb[2].mxu1  ;;  %v1201_v32 = vmul.f32 %v2529_v12, %v478_v4  ;;  %v1176_v39 = vpop.f32.mrb[3].mxu0 }
 0x156   : > { %v1982_v33 = vmul.f32 %v2607_v13, %v1260_v45  ;;  %v1957_v44 = vpop.f32.mrb[3].mxu1  ;;  %v1205_v55 = vrot.slane %v1204_v11, 4  ;;  %v1200_v0 = vmul.f32 %v1176_v39, %v477_v46 }
 0x157   : > { %v1986_v58 = vrot.slane %v1985_v7, 4  ;;  %v1981_v17 = vmul.f32 %v1957_v44, %v1259_v2 }
 0x158   : > { %v1206_v22 = vadd.f32 %v1205_v55, %v1204_v11  ;;  %v1211_v43 = vadd.f32 %v1201_v32, %v1200_v0  ;;  %v2532_v51 = vpop.f32.mrb[4].mxu0 }
 0x159   : > { %v1987_v31 = vadd.f32 %v1986_v58, %v1985_v7  ;;  %v1992_v52 = vadd.f32 %v1982_v33, %v1981_v17  ;;  %v2610_v56 = vpop.f32.mrb[4].mxu1  ;;  %v1203_v9 = vmul.f32 %v2532_v51, %v478_v4  ;;  %v1188_v19 = vpop.f32.mrb[5].mxu0 }
 0x15a   : > { %v1984_v15 = vmul.f32 %v2610_v56, %v1260_v45  ;;  %v1969_v59 = vpop.f32.mrb[5].mxu1  ;;  %v1207_v5 = vrot.slane %v1206_v22, 2  ;;  %v1212_v42 = vrot.slane %v1211_v43, 4  ;;  %v1202_v41 = vmul.f32 %v1188_v19, %v477_v46 }
 0x15b   : > { %v1988_v40 = vrot.slane %v1987_v31, 2  ;;  %v1993_v20 = vrot.slane %v1992_v52, 4  ;;  %v1983_v24 = vmul.f32 %v1969_v59, %v1259_v2  ;;  %v2892_v56 = vmov (!%p2355_p0), 0.0  }
 0x15c   : > { %v1208_v14 = vadd.f32 %v1207_v5, %v1206_v22  ;;  %v1213_v18 = vadd.f32 %v1212_v42, %v1211_v43  ;;  %v1218_v28 = vadd.f32 %v1203_v9, %v1202_v41  ;;  %2062 = vst [vmem:[%s367_s17] sm:$0x1] (!%p2355_p0), %v2892_v56 }
 0x15d   : > { %v1989_v16 = vadd.f32 %v1988_v40, %v1987_v31  ;;  %v1994_v25 = vadd.f32 %v1993_v20, %v1992_v52  ;;  %v1999_v1 = vadd.f32 %v1984_v15, %v1983_v24 }
 0x15e   : > { %v1209_v29 = vrot.slane %v1208_v14, 1  ;;  %v1214_v35 = vrot.slane %v1213_v18, 2  ;;  %v1219_v37 = vrot.slane %v1218_v28, 4 }
 0x15f   : > { %v1990_v34 = vrot.slane %v1989_v16, 1  ;;  %v1995_v36 = vrot.slane %v1994_v25, 2  ;;  %v2000_v38 = vrot.slane %v1999_v1, 4 }
 0x160   : > { %v1210_v47 = vadd.f32 %v1209_v29, %v1208_v14  ;;  %v1215_v49 = vadd.f32 %v1214_v35, %v1213_v18  ;;  %v1220_v23 = vadd.f32 %v1219_v37, %v1218_v28 }
 0x161   : > { %v1991_v48 = vadd.f32 %v1990_v34, %v1989_v16  ;;  %v1996_v50 = vadd.f32 %v1995_v36, %v1994_v25  ;;  %v2001_v4 = vadd.f32 %v2000_v38, %v1999_v1 }
 0x162   : > { %v2020_v45 = vmul.f32 %v2019_v26, %v1210_v47  ;;  %v1216_v2 = vrot.slane %v1215_v49, 1  ;;  %v1221_v8 = vrot.slane %v1220_v23, 2 }
 0x163   : > { %v2027_v46 = vmul.f32 %v2026_v27, %v1991_v48  ;;  %v1997_v53 = vrot.slane %v1996_v50, 1  ;;  %v2002_v60 = vrot.slane %v2001_v4, 2 }
 0x164   : > { %v1217_v61 = vadd.f32 %v1216_v2, %v1215_v49  ;;  %v1222_v3 = vadd.f32 %v1221_v8, %v1220_v23 }
 0x165   : > { %v2030_v21 = vadd.f32 %v2027_v46, %v2020_v45  ;;  %v1998_v63 = vadd.f32 %v1997_v53, %v1996_v50  ;;  %v2003_v10 = vadd.f32 %v2002_v60, %v2001_v4 }
 0x166   : > { %v2021_v30 = vmul.f32 %v2019_v26, %v1217_v61  ;;  %v2047_v11 = vsel %vm2037_vm2, %v1217_v61, %v1210_v47  ;;  %v1223_v13 = vrot.slane %v1222_v3, 1 }
 0x167   : > { %v2028_v7 = vmul.f32 %v2026_v27, %v1998_v63  ;;  %v2054_v12 = vsel %vm2037_vm2, %v1998_v63, %v1991_v48  ;;  %v2004_v32 = vrot.slane %v2003_v10, 1 }
 0x168   : > { %v1224_v39 = vadd.f32 %v1223_v13, %v1222_v3 }
 0x169   : > { %v2031_v33 = vadd.f32 %v2028_v7, %v2021_v30  ;;  %v2005_v44 = vadd.f32 %v2004_v32, %v2003_v10 }
 0x16a   : > { %v2022_v58 = vmul.f32 %v2019_v26, %v1224_v39  ;;  %v2048_v0 = vsel %vm2040_vm3, %v1224_v39, %v2047_v11 }
 0x16b   : > { %v2036_v55 = vrot.slane %v2031_v33, 7  ;;  %v2029_v17 = vmul.f32 %v2026_v27, %v2005_v44  ;;  %v2055_v22 = vsel %vm2040_vm3, %v2005_v44, %v2054_v12  ;;  %2050 = vst [vmem:[%s411_s20] sm:$0x7] %v2048_v0 }
 0x16c   : > { %2057 = vst [vmem:[%s423_s11] sm:$0x7] %v2055_v22  ;;  %2061 = sbr.rel (%p2355_p0) target bundleno = 371 (0x173), region = 36 }
 0x16d   : > { %v2038_v31 = vsel %vm2037_vm2, %v2036_v55, %v2030_v21  ;;  %v2032_v43 = vadd.f32 %v2029_v17, %v2022_v58 }
 0x16f   : > { %v2039_v52 = vrot.slane %v2032_v43, 6 }
 0x171   : > { %v2041_v51 = vsel %vm2040_vm3, %v2039_v52, %v2038_v31 }
 0x172   : > { %2043 = vst [vmem:[%s399_s15] sm:$0x7] %v2041_v51 }
 0x173 PF: > { %v2063_v57 = vld [vmem:[%s367_s17] sm:$0x1]  ;;  %v2064_v6 = vadd.f32 %v3152_v62, %v3139_v54  ;;  %s2356_s8 = sshll.u32 %s2878_s25, 4  ;;  %s2126_s14 = sshll.u32 %s367_s17, 4  ;;  %s3374_s14 = int_to_ptr.vmem [resolvable:$true] %s2126_s14 }
 0x174   : > { %s3372_s29 = scalar_lea.hbm %s3433_s6, %s2356_s8  ;;  %s3441_s24 = sand.u32 1, %s2866_s22  }
 0x175   : > { %v2065_v9 = vadd.f32 %v2064_v6, %v2063_v57  ;;  %s2098_s30 = scalar_lea.sflag [#allocation3], %s3441_s24  ;;  %s2796_s11 = scalar_lea.vmem %s3374_s14, 16 }
 0x176   : > { %p2797_p1 = scmp.ne.s32.totalorder %s3374_s14, %s2796_s11  ;;  %s2893_s25 = smov [#allocation2]  }
 0x177   : > { %2066 = vst [vmem:[%s367_s17] sm:$0x1] %v2065_v9  ;;  %s2800_s19 = sshll.u32 %s2893_s25, 4  ;;  %s2801_s19 = int_to_ptr.vmem [resolvable:$false] %s2800_s19 }
 0x178   : > { %p2798_p2 = pnand %p2797_p1, %p2978_p3  ;;  %s2802_s12 = scalar_lea.vmem %s2801_s19, 32 }
 0x179   : > { %p2803_p5 = scmp.lt.s32.totalorder %s3374_s14, %s2801_s19  ;;  %p2804_p6 = scmp.lt.s32.totalorder %s2802_s12, %s2796_s11 }
 0x17a   : > { %p2799_p4 = pneg %p2798_p2 }
 0x17b   : > { %p2805_p7 = por %p2804_p6, %p2803_p5 }
 0x17d   : > { %p2806_p8 = pnand %p2805_p7, %p2799_p4 }
 0x17f   : > { %2809 = shalt.err (!%p2806_p8)
}
 0x180   : > { %s2810_s15 = scalar_lea.hbm %s3372_s29, 16  ;;  %s2814_s8 = scalar_lea.hbm %s3433_s6, 32 }
 0x181   : > { %p2811_p10 = scmp.ne.s32.totalorder %s3372_s29, %s2810_s15  ;;  %p2815_p13 = scmp.lt.u32.totalorder %s3372_s29, %s3433_s6 }
 0x182   : > { %p2816_p0 = scmp.lt.u32.totalorder %s2814_s8, %s2810_s15  ;;  %p2818_p2 = scmp.lt.u32.totalorder %s2810_s15, %s3372_s29 }
 0x183   : > { %p2812_p11 = pnand %p2811_p10, %p2978_p3 }
 0x184   : > { %p2817_p1 = por %p2816_p0, %p2815_p13 }
 0x185   : > { %p2813_p12 = pneg %p2812_p11 }
 0x186   : > { %p2819_p4 = por %p2818_p2, %p2817_p1 }
 0x188   : > { %p2820_p5 = pnand %p2819_p4, %p2813_p12 }
 0x18a   : > { %2823 = shalt.err (!%p2820_p5)
}
 0x18b   : > { %2724 = dma.vmem_to_hbm [thread:$0]  (%p2978_p3), %s3374_s14, 16, %s3372_s29, %s2098_s30  }
 0x18c PF: > { %p2730_p6 = scmp.ge.s32.totalorder %s2890_s28, 2  ;;  %s2177_s24 = sand.u32 1, %s2862_s21  }
 0x18d   : > { %s2178_s11 = scalar_lea.sflag [#allocation3], %s2177_s24 }
 0x18e   : > { %p2727_p7 = pnand %p2730_p6, %p2988_p9 }
 0x190   : > { %2857 = dma.done.wait (!%p2727_p7), %s2178_s11, 16  }
 0x191   : > { %2859 = vsyncadd (!%p2727_p7), %s2178_s11, 4294967280  ;;  %s20_s28 = sadd.s32 1, %s2890_s28   ;;  %s3442_s9 = sld [smem:[#allocation5_spill]] }
 0x192   : > { %p17_p8 = scmp.ge.s32.totalorder %s20_s28, 6   ;;  %s3443_s21 = smov %s2866_s22 }
 0x193   : > { %s3444_s22 = smov %s2870_s23  ;;  %s3445_s23 = smov %s2996_s13 }
 0x194   : > { %s3446_s24 = smov %s2882_s26  ;;  %s3447_s25 = smov %s2886_s27 }
 0x195   : > { %s3448_s26 = smov %s3451_s7  ;;  %19 = sbr.rel (!%p17_p8) target bundleno = 5 (0x5), region = 113 }
 0x197   : > { %s3449_s27 = smov %s3442_s9 }
 0x19c   :  { %2182 = vsyncpa [#allocation3], 1 }
 0x19d   :  { %2184 = vsyncpa [#allocation3 + $0x1], 1 }

</bundles_post_ra>
